<compile_context>
chip_gen: v5e
topology: v5e:2x2
jax: 0.10.0
libtpu: 0.0.40
codegen_flags: <defaults>
</compile_context>

<pallas_src>
import jax
import jax.numpy as jnp
from jax import lax
from jax.experimental import pallas as pl
from jax.experimental.pallas import tpu as pltpu

# ---------------- model hyper-parameters (ModelParam) ----------------
VOCAB_SIZE = 50
EMBED_DIM = 32
KERNEL_NUM = 8                 # out_channel of each conv
KERNEL_SIZES = (3, 4, 5)       # kernel_size_list
CLASS_NUM = 2
SEQ_LEN = 16
BATCH = 2


def _round_up(x, m):
    return (x + m - 1) // m * m


# ---------------- derived static layout constants ----------------
K_MAX = max(KERNEL_SIZES)                          # 5
K_MIN = min(KERNEL_SIZES)                          # 3
V_PAD = _round_up(VOCAB_SIZE, 8)                   # 56 padded vocab rows per tap
NC = len(KERNEL_SIZES) * KERNEL_NUM                # 24 concat feature width
T_STRIDE = _round_up(SEQ_LEN - K_MIN + 1, 8)       # 16 windows per batch (8-aligned)
R = BATCH * T_STRIDE                               # 32 window rows total
KW = K_MAX * V_PAD                                 # 280 logical contraction
KW_PAD = _round_up(KW, 128)                        # 384 MXU-aligned contraction
OUT_W = _round_up(max(CLASS_NUM, 128), 128)        # 128 lane-dense width
B_OUT = _round_up(BATCH, 8)                        # 8 padded output rows

# row offsets inside the single 128-lane-wide parameter slab (all 8-aligned)
R_G = 0                                            # fused embed@conv weight rows
R_CB = KW_PAD                                      # 384  conv bias row
R_TH = R_CB + 8                                    # 392  per-column mask threshold row
R_FC = R_TH + 8                                    # 400  fc weight rows (OUT_W of them)
R_FB = R_FC + OUT_W                                # 528  fc bias row
SLAB_ROWS = _round_up(R_FB + 1, 8)                 # 536


def textcnn_kernel(wid_ref, slab_ref, out_ref):
    """Fused TextCNN forward.

    wid_ref  : (R, K_MAX) int32 per-window token ids, pre-offset by k*V_PAD,
               -1 for padding positions (never matches the column iota).
    slab_ref : (SLAB_ROWS, OUT_W) f32 packed params
               [G | conv bias | mask thresholds | fc weight | fc bias]
    out_ref  : (B_OUT, OUT_W) f32 padded logits (sliced in the wrapper).
    """
    # ---- one-hot over (tap, vocab): gather + im2col + conv fused in one matmul ----
    ids = wid_ref[...]                                          # (R, K_MAX) int32
    col = lax.broadcasted_iota(jnp.int32, (R, KW_PAD), 1)       # lane iota
    hit = (col == ids[:, 0:1])
    for k in range(1, K_MAX):
        hit = jnp.logical_or(hit, col == ids[:, k:k + 1])       # disjoint segments
    onehot = hit.astype(jnp.float32)                            # (R, KW_PAD)

    g = slab_ref[R_G:R_G + KW_PAD, :]                           # (KW_PAD, OUT_W)
    cb = slab_ref[R_CB:R_CB + 1, :]                             # (1, OUT_W) conv bias
    acc = jnp.dot(onehot, g, preferred_element_type=jnp.float32) + cb
    acc = jnp.maximum(acc, 0.0)                                 # ReLU (VPU)

    # ---- time-validity mask (one compare vs preloaded threshold row) ----
    # Zero-masking before max is safe only because activations are ReLU (>= 0).
    th = slab_ref[R_TH:R_TH + 1, :].astype(jnp.int32)           # (1, OUT_W)
    t_idx = lax.broadcasted_iota(jnp.int32, (T_STRIDE, OUT_W), 0)
    mask = t_idx < th                                           # (T_STRIDE, OUT_W) bool

    # ---- per-batch max-pool over time: 8-aligned static views + sublane reduce ----
    feats = []
    for b in range(BATCH):
        blk = acc[b * T_STRIDE:(b + 1) * T_STRIDE, :]           # aligned free view
        feats.append(jnp.max(jnp.where(mask, blk, 0.0), axis=0, keepdims=True))
    feats.append(jnp.zeros((B_OUT - BATCH, OUT_W), jnp.float32))
    feat = jnp.concatenate(feats, axis=0)                       # (B_OUT, OUT_W)

    # dropout: eval-mode identity
    # TODO(synk): training-mode stochastic dropout not implemented (inference path).

    # ---- final linear; lane-dense (B_OUT, 128) store ----
    fcw = slab_ref[R_FC:R_FC + OUT_W, :]                        # (OUT_W, OUT_W)
    fcb = slab_ref[R_FB:R_FB + 1, :]                            # (1, OUT_W)
    out_ref[...] = jnp.dot(feat, fcw, preferred_element_type=jnp.float32) + fcb


# ---------------- host-side packing (done ONCE at init, outside per-call jit) ----------------
def pack_param_slab(embed, conv_ws, conv_bs, fc_w, fc_b):
    """Fold embedding into the conv weights and pack everything into one slab."""
    slab = jnp.zeros((SLAB_ROWS, OUT_W), jnp.float32)
    col = 0
    for w, b in zip(conv_ws, conv_bs):
        C, K, D = w.shape
        for k in range(K):
            gk = embed @ w[:, k, :].T                           # (VOCAB_SIZE, C)
            slab = slab.at[R_G + k * V_PAD:R_G + k * V_PAD + VOCAB_SIZE,
                           col:col + C].set(gk)
        slab = slab.at[R_CB, col:col + C].set(b.reshape(-1))
        slab = slab.at[R_TH, col:col + C].set(float(SEQ_LEN - K + 1))
        col += C
    slab = slab.at[R_FC:R_FC + NC, :CLASS_NUM].set(fc_w.T)
    slab = slab.at[R_FB, :CLASS_NUM].set(fc_b.reshape(-1))
    return slab
    # Invariants relied on by the kernel: rows of G outside the written ranges
    # stay exactly zero (padded vocab rows, taps k >= K, contraction pad rows),
    # and threshold columns >= NC stay zero (fully masked).


def build_window_ids(token_ids):
    """(B, SEQ_LEN) tokens -> (R, K_MAX) pre-offset per-window ids; -1 = padding."""
    tok = token_ids.astype(jnp.int32)
    tok_pad = jnp.full((BATCH, T_STRIDE + K_MAX - 1), -1, dtype=jnp.int32)
    tok_pad = tok_pad.at[:, :SEQ_LEN].set(tok)
    gather_idx = jnp.arange(T_STRIDE)[:, None] + jnp.arange(K_MAX)[None, :]
    w = tok_pad[:, gather_idx]                                  # (B, T_STRIDE, K_MAX)
    offs = (jnp.arange(K_MAX, dtype=jnp.int32) * V_PAD)[None, None, :]
    wid = jnp.where(w >= 0, w + offs, -1)
    return wid.reshape(R, K_MAX)


@jax.jit
def textcnn_forward(token_ids, param_slab):
    wid = build_window_ids(token_ids)
    vmem = pl.BlockSpec(memory_space=pltpu.MemorySpace.VMEM)
    out = pl.pallas_call(
        textcnn_kernel,
        out_shape=jax.ShapeDtypeStruct((B_OUT, OUT_W), jnp.float32),
        in_specs=[vmem, vmem],
        out_specs=vmem,
    )(wid, param_slab)
    return out[:BATCH, :CLASS_NUM]


# ---------------- pure-JAX reference (matches the PyTorch module) ----------------
def textcnn_reference(token_ids, embed, conv_ws, conv_bs, fc_w, fc_b):
    x = jnp.take(embed, token_ids, axis=0)                      # (B, L, D)
    feats = []
    for w, b in zip(conv_ws, conv_bs):
        C, K, D = w.shape
        T = SEQ_LEN - K + 1
        wins = jnp.stack([x[:, t:t + K, :].reshape(BATCH, K * D)
                          for t in range(T)], axis=1)           # (B, T, K*D)
        conv = jnp.einsum('btf,cf->btc', wins, w.reshape(C, K * D)) + b.reshape(1, 1, C)
        conv = jnp.maximum(conv, 0.0)
        feats.append(jnp.max(conv, axis=1))                     # (B, C)
    feat = jnp.concatenate(feats, axis=1)
    return feat @ fc_w.T + fc_b


def init_params(key):
    keys = jax.random.split(key, 2 + 2 * len(KERNEL_SIZES) + 2)
    ki = iter(keys)
    embed = jax.random.normal(next(ki), (VOCAB_SIZE, EMBED_DIM),
                              dtype=jnp.float32) * 0.1
    conv_ws, conv_bs = [], []
    for K in KERNEL_SIZES:
        w = jax.random.normal(next(ki), (KERNEL_NUM, K, EMBED_DIM),
                              dtype=jnp.float32) * 0.1
        b = jax.random.normal(next(ki), (1, KERNEL_NUM),
                              dtype=jnp.float32) * 0.01
        conv_ws.append(w)
        conv_bs.append(b)
    fc_w = jax.random.normal(next(ki),
                             (CLASS_NUM, len(KERNEL_SIZES) * KERNEL_NUM),
                             dtype=jnp.float32) * 0.1
    fc_b = jax.random.normal(next(ki), (1, CLASS_NUM),
                             dtype=jnp.float32) * 0.01
    return embed, conv_ws, conv_bs, fc_w, fc_b


if __name__ == "__main__":
    key = jax.random.PRNGKey(0)
    pkey, xkey = jax.random.split(key)
    embed, conv_ws, conv_bs, fc_w, fc_b = init_params(pkey)

    # Pack parameters ONCE (hoisted out of the per-call forward).
    param_slab = pack_param_slab(embed, conv_ws, conv_bs, fc_w, fc_b)
    param_slab = jax.block_until_ready(param_slab)

    token_ids = jax.random.randint(xkey, (BATCH, SEQ_LEN), 0, VOCAB_SIZE,
                                   dtype=jnp.int32)

    logits = textcnn_forward(token_ids, param_slab)
    logits = jax.block_until_ready(logits)
    assert logits.shape == (BATCH, CLASS_NUM)

    ref = textcnn_reference(token_ids, embed, conv_ws, conv_bs, fc_w, fc_b)
    assert jnp.allclose(logits, ref, atol=5e-3, rtol=5e-2), (logits, ref)

    print("KERNEL_OK")
</pallas_src>

<mosaic_0001>
module attributes {stable_mosaic.version = 11 : i64} {
  func.func @textcnn_kernel(%arg0: memref<32x5xi32, #tpu.memory_space<vmem>>, %arg1: memref<536x128xf32, #tpu.memory_space<vmem>>, %arg2: memref<8x128xf32, #tpu.memory_space<vmem>>) attributes {dimension_semantics = [], scalar_prefetch = 0 : i64, scratch_operands = 0 : i64, tpu.core_type = #tpu.core_type<tc>} {
    %c0 = arith.constant 0 : index
    %c0_0 = arith.constant 0 : index
    %0 = vector.load %arg0[%c0, %c0_0] : memref<32x5xi32, #tpu.memory_space<vmem>>, vector<32x5xi32>
    %1 = tpu.iota {dimensions = array<i32: 1>} : vector<32x384xi32>
    %2 = vector.extract_strided_slice %0 {offsets = [0, 0], sizes = [32, 1], strides = [1, 1]} : vector<32x5xi32> to vector<32x1xi32>
    %3 = vector.broadcast %2 : vector<32x1xi32> to vector<32x384xi32>
    %4 = arith.cmpi eq, %1, %3 : vector<32x384xi32>
    %5 = vector.extract_strided_slice %0 {offsets = [0, 1], sizes = [32, 1], strides = [1, 1]} : vector<32x5xi32> to vector<32x1xi32>
    %6 = vector.broadcast %5 : vector<32x1xi32> to vector<32x384xi32>
    %7 = arith.cmpi eq, %1, %6 : vector<32x384xi32>
    %8 = arith.ori %4, %7 : vector<32x384xi1>
    %9 = vector.extract_strided_slice %0 {offsets = [0, 2], sizes = [32, 1], strides = [1, 1]} : vector<32x5xi32> to vector<32x1xi32>
    %10 = vector.broadcast %9 : vector<32x1xi32> to vector<32x384xi32>
    %11 = arith.cmpi eq, %1, %10 : vector<32x384xi32>
    %12 = arith.ori %8, %11 : vector<32x384xi1>
    %13 = vector.extract_strided_slice %0 {offsets = [0, 3], sizes = [32, 1], strides = [1, 1]} : vector<32x5xi32> to vector<32x1xi32>
    %14 = vector.broadcast %13 : vector<32x1xi32> to vector<32x384xi32>
    %15 = arith.cmpi eq, %1, %14 : vector<32x384xi32>
    %16 = arith.ori %12, %15 : vector<32x384xi1>
    %17 = vector.extract_strided_slice %0 {offsets = [0, 4], sizes = [32, 1], strides = [1, 1]} : vector<32x5xi32> to vector<32x1xi32>
    %18 = vector.broadcast %17 : vector<32x1xi32> to vector<32x384xi32>
    %19 = arith.cmpi eq, %1, %18 : vector<32x384xi32>
    %20 = arith.ori %16, %19 : vector<32x384xi1>
    %21 = arith.extui %20 : vector<32x384xi1> to vector<32x384xi32>
    %22 = arith.sitofp %21 : vector<32x384xi32> to vector<32x384xf32>
    %c0_1 = arith.constant 0 : index
    %c0_2 = arith.constant 0 : index
    %23 = vector.load %arg1[%c0_1, %c0_2] : memref<536x128xf32, #tpu.memory_space<vmem>>, vector<384x128xf32>
    %c384 = arith.constant 384 : index
    %c0_3 = arith.constant 0 : index
    %24 = vector.load %arg1[%c384, %c0_3] : memref<536x128xf32, #tpu.memory_space<vmem>>, vector<1x128xf32>
    %cst = arith.constant dense<0.000000e+00> : vector<32x128xf32>
    %25 = tpu.matmul %22, %23, %cst {dimension_numbers = #tpu.dot_dimension_numbers<[1], [0], [0], [1], [0, 0, 1, 1], [], []>} : vector<32x384xf32>, vector<384x128xf32>, vector<32x128xf32> -> vector<32x128xf32>
    %26 = vector.broadcast %24 : vector<1x128xf32> to vector<32x128xf32>
    %27 = arith.addf %25, %26 : vector<32x128xf32>
    %cst_4 = arith.constant 0.000000e+00 : f32
    %28 = vector.broadcast %cst_4 : f32 to vector<32x128xf32>
    %29 = arith.maximumf %27, %28 : vector<32x128xf32>
    %c392 = arith.constant 392 : index
    %c0_5 = arith.constant 0 : index
    %30 = vector.load %arg1[%c392, %c0_5] : memref<536x128xf32, #tpu.memory_space<vmem>>, vector<1x128xf32>
    %31 = arith.fptosi %30 : vector<1x128xf32> to vector<1x128xi32>
    %32 = tpu.iota {dimensions = array<i32: 0>} : vector<16x128xi32>
    %33 = vector.broadcast %31 : vector<1x128xi32> to vector<16x128xi32>
    %34 = arith.cmpi slt, %32, %33 : vector<16x128xi32>
    %35 = vector.extract_strided_slice %29 {offsets = [0, 0], sizes = [16, 128], strides = [1, 1]} : vector<32x128xf32> to vector<16x128xf32>
    %cst_6 = arith.constant 0.000000e+00 : f32
    %36 = vector.broadcast %cst_6 : f32 to vector<16x128xf32>
    %37 = arith.select %34, %35, %36 : vector<16x128xi1>, vector<16x128xf32>
    %cst_7 = arith.constant dense<0xFF800000> : vector<128xf32>
    %38 = vector.multi_reduction <maximumf>, %37, %cst_7 [0] : vector<16x128xf32> to vector<128xf32>
    %39 = vector.shape_cast %38 : vector<128xf32> to vector<1x128xf32>
    %40 = vector.extract_strided_slice %29 {offsets = [16, 0], sizes = [16, 128], strides = [1, 1]} : vector<32x128xf32> to vector<16x128xf32>
    %cst_8 = arith.constant 0.000000e+00 : f32
    %41 = vector.broadcast %cst_8 : f32 to vector<16x128xf32>
    %42 = arith.select %34, %40, %41 : vector<16x128xi1>, vector<16x128xf32>
    %cst_9 = arith.constant dense<0xFF800000> : vector<128xf32>
    %43 = vector.multi_reduction <maximumf>, %42, %cst_9 [0] : vector<16x128xf32> to vector<128xf32>
    %44 = vector.shape_cast %43 : vector<128xf32> to vector<1x128xf32>
    %cst_10 = arith.constant 0.000000e+00 : f32
    %45 = vector.broadcast %cst_10 : f32 to vector<6x128xf32>
    %46 = tpu.concatenate %39, %44, %45 in 0 : vector<1x128xf32>, vector<1x128xf32>, vector<6x128xf32> -> vector<8x128xf32>
    %c400 = arith.constant 400 : index
    %c0_11 = arith.constant 0 : index
    %47 = vector.load %arg1[%c400, %c0_11] : memref<536x128xf32, #tpu.memory_space<vmem>>, vector<128x128xf32>
    %c528 = arith.constant 528 : index
    %c0_12 = arith.constant 0 : index
    %48 = vector.load %arg1[%c528, %c0_12] : memref<536x128xf32, #tpu.memory_space<vmem>>, vector<1x128xf32>
    %cst_13 = arith.constant dense<0.000000e+00> : vector<8x128xf32>
    %49 = tpu.matmul %46, %47, %cst_13 {dimension_numbers = #tpu.dot_dimension_numbers<[1], [0], [0], [1], [0, 0, 1, 1], [], []>} : vector<8x128xf32>, vector<128x128xf32>, vector<8x128xf32> -> vector<8x128xf32>
    %50 = vector.broadcast %48 : vector<1x128xf32> to vector<8x128xf32>
    %51 = arith.addf %49, %50 : vector<8x128xf32>
    %c0_14 = arith.constant 0 : index
    %c0_15 = arith.constant 0 : index
    %52 = vector.load %arg2[%c0_14, %c0_15] : memref<8x128xf32, #tpu.memory_space<vmem>>, vector<8x128xf32>
    tpu.vector_store %arg2[%c0_14, %c0_15], %51 {strides = array<i32>} : memref<8x128xf32, #tpu.memory_space<vmem>>, vector<8x128xf32>,
    return
  }
}

</mosaic_0001>

<bundles_post_ra>
// kernel: textcnn_forward.1
= control target key start
LH: loop header
LB: loop body
LE: loop exit
PB: predicated region body
PF: predicated region fallthrough
CT: control target
= control target key end

     0   :  { %v471_v0 = vmov 2   ;;  %v472_v1 = vmov 0   ;;  %v473_v3 = vmov 4   ;;  %v474_v4 = vmov 3   ;;  %s821_s0 = inlined_call_operand.vmem [shape: s32[32,5], index: 0, kind: input, shape index: {}]   ;;  %s822_s1 = inlined_call_operand.vmem [shape: f32[536,128], index: 1, kind: input, shape index: {}]   ;;  %s823_s2 = inlined_call_operand.vmem [shape: f32[8,128], index: 2, kind: output, shape index: {}]  }
   0x1   :  { %451 = vset.pattern.permute.xlu1 %v471_v0  ;;  %449 = vset.pattern.permute.xlu0 %v472_v1  ;;  %v11_v2 = vld [vmem:[%s821_s0] sm:$0xff]  ;;  %v475_v5 = vmov 1   ;;  %v12_v6 = vld [vmem:[%s821_s0 + $0x8] sm:$0xff]  ;;  %v13_v7 = vld [vmem:[%s821_s0 + $0x10] sm:$0xff]  ;;  %v15_v60 = vlaneseq }
   0x2   :  { %80 = vperm.xlu1 %451, %v11_v2   ;;  %20 = vperm.xlu0 %449, %v11_v2   ;;  %v226_v8 = vld [vmem:[%s822_s1 + $0x78] sm:$0xff]  ;;  %v225_v12 = vld [vmem:[%s822_s1 + $0x70] sm:$0xff]  ;;  %v224_v15 = vld [vmem:[%s822_s1 + $0x68] sm:$0xff] }
   0x3   :  { %453 = vset.pattern.permute.xlu2 %v473_v3  ;;  %v242_v9 = vld [vmem:[%s822_s1 + $0xf8] sm:$0xff]  ;;  %261 = vmatpush.msra.mxu0 %v226_v8  ;;  %v241_v13 = vld [vmem:[%s822_s1 + $0xf0] sm:$0xff]  ;;  %v240_v16 = vld [vmem:[%s822_s1 + $0xe8] sm:$0xff]  ;;  %v667_v62 = vand.u32 127, %v15_v60 }
   0x4   :  { %152 = vperm.xlu2 %453, %v11_v2   ;;  %v258_v10 = vld [vmem:[%s822_s1 + $0x178] sm:$0xff]  ;;  %290 = vmatpush.msra.mxu1 %v242_v9  ;;  %v257_v14 = vld [vmem:[%s822_s1 + $0x170] sm:$0xff]  ;;  %v256_v17 = vld [vmem:[%s822_s1 + $0x168] sm:$0xff] }
   0x5   :  { %v14_v11 = vld [vmem:[%s821_s0 + $0x18] sm:$0xff]  ;;  %319 = vmatpush.msra.mxu2 %v258_v10  ;;  %262 = vmatpush.msra.mxu0 %v225_v12  ;;  %v223_v18 = vld [vmem:[%s822_s1 + $0x60] sm:$0xff]  ;;  %v221_v24 = vld [vmem:[%s822_s1 + $0x50] sm:$0xff] }
   0x6   :  { %291 = vmatpush.msra.mxu1 %v241_v13  ;;  %v239_v19 = vld [vmem:[%s822_s1 + $0xe0] sm:$0xff]  ;;  %v222_v21 = vld [vmem:[%s822_s1 + $0x58] sm:$0xff]  ;;  %v237_v25 = vld [vmem:[%s822_s1 + $0xd0] sm:$0xff] }
   0x7   :  { %320 = vmatpush.msra.mxu2 %v257_v14  ;;  %263 = vmatpush.msra.mxu0 %v224_v15  ;;  %v255_v20 = vld [vmem:[%s822_s1 + $0x160] sm:$0xff]  ;;  %v238_v22 = vld [vmem:[%s822_s1 + $0xd8] sm:$0xff]  ;;  %v253_v26 = vld [vmem:[%s822_s1 + $0x150] sm:$0xff] }
   0x8   :  { %292 = vmatpush.msra.mxu1 %v240_v16  ;;  %v254_v23 = vld [vmem:[%s822_s1 + $0x158] sm:$0xff]  ;;  %v220_v27 = vld [vmem:[%s822_s1 + $0x48] sm:$0xff]  ;;  %v219_v30 = vld [vmem:[%s822_s1 + $0x40] sm:$0xff] }
   0x9   :  { %321 = vmatpush.msra.mxu2 %v256_v17  ;;  %264 = vmatpush.msra.mxu0 %v223_v18  ;;  %v236_v28 = vld [vmem:[%s822_s1 + $0xc8] sm:$0xff]  ;;  %v235_v31 = vld [vmem:[%s822_s1 + $0xc0] sm:$0xff]  ;;  %v218_v33 = vld [vmem:[%s822_s1 + $0x38] sm:$0xff]  ;;  %v824_v18 = vmov 0 }
   0xa   :  { %452 = vset.pattern.permute.xlu1 %v474_v4  ;;  %450 = vset.pattern.permute.xlu0 %v475_v5  ;;  %v252_v29 = vld [vmem:[%s822_s1 + $0x148] sm:$0xff]  ;;  %v251_v32 = vld [vmem:[%s822_s1 + $0x140] sm:$0xff]  ;;  %v234_v34 = vld [vmem:[%s822_s1 + $0xb8] sm:$0xff] }
   0xb   :  { %116 = vperm.xlu1 %452, %v11_v2   ;;  %44 = vperm.xlu0 %450, %v11_v2   ;;  %v250_v35 = vld [vmem:[%s822_s1 + $0x138] sm:$0xff]  ;;  %v217_v36 = vld [vmem:[%s822_s1 + $0x30] sm:$0xff]  ;;  %v216_v39 = vld [vmem:[%s822_s1 + $0x28] sm:$0xff]  ;;  %v680_v2 = vadd.s32 256, %v667_v62 }
   0xc   :  { %454 = vset.pattern.permute.xlu2 %v472_v1  ;;  %293 = vmatpush.msra.mxu1 %v239_v19  ;;  %v233_v37 = vld [vmem:[%s822_s1 + $0xb0] sm:$0xff]  ;;  %v232_v40 = vld [vmem:[%s822_s1 + $0xa8] sm:$0xff]  ;;  %v215_v42 = vld [vmem:[%s822_s1 + $0x20] sm:$0xff] }
   0xd   :  { %23 = vperm.xlu2 %454, %v12_v6   ;;  %322 = vmatpush.msra.mxu2 %v255_v20  ;;  %v249_v38 = vld [vmem:[%s822_s1 + $0x130] sm:$0xff]  ;;  %v248_v41 = vld [vmem:[%s822_s1 + $0x128] sm:$0xff]  ;;  %v231_v43 = vld [vmem:[%s822_s1 + $0xa0] sm:$0xff] }
   0xe   :  { %265 = vmatpush.msra.mxu0 %v222_v21  ;;  %294 = vmatpush.msra.mxu1 %v238_v22  ;;  %v247_v44 = vld [vmem:[%s822_s1 + $0x120] sm:$0xff]  ;;  %v214_v45 = vld [vmem:[%s822_s1 + $0x18] sm:$0xff]  ;;  %v213_v48 = vld [vmem:[%s822_s1 + $0x10] sm:$0xff] }
   0xf   :  { %323 = vmatpush.msra.mxu2 %v254_v23  ;;  %v230_v46 = vld [vmem:[%s822_s1 + $0x98] sm:$0xff]  ;;  %v229_v49 = vld [vmem:[%s822_s1 + $0x90] sm:$0xff]  ;;  %v212_v51 = vld [vmem:[%s822_s1 + $0x8] sm:$0xff] }
  0x10   :  { %266 = vmatpush.msra.mxu0 %v221_v24  ;;  %295 = vmatpush.msra.mxu1 %v237_v25  ;;  %v246_v47 = vld [vmem:[%s822_s1 + $0x118] sm:$0xff]  ;;  %v245_v50 = vld [vmem:[%s822_s1 + $0x110] sm:$0xff]  ;;  %v228_v52 = vld [vmem:[%s822_s1 + $0x88] sm:$0xff] }
  0x11   :  { %324 = vmatpush.msra.mxu2 %v253_v26  ;;  %v244_v53 = vld [vmem:[%s822_s1 + $0x108] sm:$0xff]  ;;  %v211_v54 = vld [vmem:[%s822_s1] sm:$0xff] }
  0x12   :  { %267 = vmatpush.msra.mxu0 %v220_v27  ;;  %296 = vmatpush.msra.mxu1 %v236_v28  ;;  %v227_v55 = vld [vmem:[%s822_s1 + $0x80] sm:$0xff] }
  0x13   :  { %455 = vset.pattern.permute.xlu1 %v475_v5  ;;  %457 = vset.pattern.permute.xlu0 %v474_v4  ;;  %v243_v56 = vld [vmem:[%s822_s1 + $0x100] sm:$0xff] }
  0x14   :  { %47 = vperm.xlu1 %455, %v12_v6   ;;  %119 = vperm.xlu0 %457, %v12_v6  }
  0x15   :  { %456 = vset.pattern.permute.xlu2 %v471_v0  ;;  %325 = vmatpush.msra.mxu2 %v252_v29 }
  0x16   :  { %83 = vperm.xlu2 %456, %v12_v6   ;;  %268 = vmatpush.msra.mxu0 %v219_v30 }
  0x17   :  { %297 = vmatpush.msra.mxu1 %v235_v31  ;;  %326 = vmatpush.msra.mxu2 %v251_v32  ;;  %v397_v31 = vld [vmem:[%s822_s1 + $0x208] sm:$0xff]  ;;  %v396_v32 = vld [vmem:[%s822_s1 + $0x200] sm:$0xff] }
  0x18   :  { %269 = vmatpush.msra.mxu0 %v218_v33  ;;  %400 = vmatpush.msra.mxu3 %v397_v31  ;;  %v395_v33 = vld [vmem:[%s822_s1 + $0x1f8] sm:$0xff] }
  0x19   :  { %298 = vmatpush.msra.mxu1 %v234_v34  ;;  %327 = vmatpush.msra.mxu2 %v250_v35  ;;  %v394_v34 = vld [vmem:[%s822_s1 + $0x1f0] sm:$0xff]  ;;  %v393_v35 = vld [vmem:[%s822_s1 + $0x1e8] sm:$0xff] }
  0x1a   :  { %270 = vmatpush.msra.mxu0 %v217_v36  ;;  %401 = vmatpush.msra.mxu3 %v396_v32 }
  0x1b   :  { %299 = vmatpush.msra.mxu1 %v233_v37  ;;  %328 = vmatpush.msra.mxu2 %v249_v38 }
  0x1c   :  { %458 = vset.pattern.permute.xlu1 %v473_v3  ;;  %122 = vperm.xlu0 %457, %v13_v7  }
  0x1d   :  { %155 = vperm.xlu1 %458, %v12_v6   ;;  %271 = vmatpush.msra.mxu0 %v216_v39  ;;  %v352_v39 = vld [vmem:[%s822_s1 + $0x188] sm:$0x1] }
  0x1e   :  { %459 = vset.pattern.permute.xlu2 %v472_v1  ;;  %300 = vmatpush.msra.mxu1 %v232_v40 }
  0x1f   :  { %26 = vperm.xlu2 %459, %v13_v7   ;;  %329 = vmatpush.msra.mxu2 %v248_v41  ;;  %v469_v41 = vld [vmem:[%s822_s1 + $0x180] ss:$0 sm:$0xff] }
  0x20   :  { %272 = vmatpush.msra.mxu0 %v215_v42  ;;  %301 = vmatpush.msra.mxu1 %v231_v43  ;;  %v439_v42 = vceil.f32 %v352_v39  ;;  %v440_v43 = vfloor.f32 %v352_v39 }
  0x21   :  { %330 = vmatpush.msra.mxu2 %v247_v44  ;;  %402 = vmatpush.msra.mxu3 %v395_v33  ;;  %v392_v44 = vld [vmem:[%s822_s1 + $0x1e0] sm:$0xff] }
  0x22   :  { %273 = vmatpush.msra.mxu0 %v214_v45  ;;  %302 = vmatpush.msra.mxu1 %v230_v46  ;;  %v391_v46 = vld [vmem:[%s822_s1 + $0x1d8] sm:$0xff] }
  0x23   :  { %331 = vmatpush.msra.mxu2 %v246_v47  ;;  %403 = vmatpush.msra.mxu3 %v394_v34 }
  0x24   :  { %464 = vset.pattern.permute.xlu0 %v475_v5  ;;  %274 = vmatpush.msra.mxu0 %v213_v48 }
  0x25   :  { %460 = vset.pattern.permute.xlu1 %v475_v5  ;;  %53 = vperm.xlu0 %464, %v14_v11  }
  0x26   :  { %50 = vperm.xlu1 %460, %v13_v7   ;;  %303 = vmatpush.msra.mxu1 %v229_v49 }
  0x27   :  { %461 = vset.pattern.permute.xlu2 %v471_v0  ;;  %332 = vmatpush.msra.mxu2 %v245_v50 }
  0x28   :  { %86 = vperm.xlu2 %461, %v13_v7   ;;  %275 = vmatpush.msra.mxu0 %v212_v51  ;;  %v390_v51 = vld [vmem:[%s822_s1 + $0x1d0] sm:$0xff] }
  0x29   :  { %304 = vmatpush.msra.mxu1 %v228_v52  ;;  %333 = vmatpush.msra.mxu2 %v244_v53 }
  0x2a   :  { %276 = vmatpush.msra.mxu0 %v211_v54  ;;  %404 = vmatpush.msra.mxu3 %v393_v35  ;;  %v355_v54 = vshrl.u32 %v15_v60, 7 }
  0x2b   :  { %305 = vmatpush.msra.mxu1 %v227_v55  ;;  %334 = vmatpush.msra.mxu2 %v243_v56  ;;  %v389_v55 = vld [vmem:[%s822_s1 + $0x1c8] sm:$0xff]  ;;  %v388_v56 = vld [vmem:[%s822_s1 + $0x1c0] sm:$0xff] }
  0x2c   :  { %405 = vmatpush.msra.mxu3 %v392_v44 }
  0x2d   :  { %468 = vset.pattern.permute.xlu0 %v473_v3 }
  0x2e   :  { %462 = vset.pattern.permute.xlu1 %v473_v3  ;;  %406 = vmatpush.msra.mxu3 %v391_v46 }
  0x2f   :  { %158 = vperm.xlu1 %462, %v13_v7  }
  0x30   :  { %463 = vset.pattern.permute.xlu2 %v472_v1  ;;  %v671_v1 = vadd.s32 128, %v667_v62  ;;  %407 = vmatpush.msra.mxu3 %v390_v51 }
  0x31   :  { %29 = vperm.xlu2 %463, %v14_v11  }
  0x32   :  { %408 = vmatpush.msra.mxu3 %v389_v55 }
  0x34   :  { %409 = vmatpush.msra.mxu3 %v388_v56 }
  0x37   :  { %465 = vset.pattern.permute.xlu1 %v471_v0 }
  0x38   :  { %89 = vperm.xlu1 %465, %v14_v11  }
  0x39   :  { %466 = vset.pattern.permute.xlu2 %v474_v4 }
  0x3a   :  { %125 = vperm.xlu2 %466, %v14_v11  }
  0x40   :  { %467 = vset.pattern.permute.xlu1 %v473_v3  ;;  %v476_v3 = vmov 0.0  }
  0x41   :  { %161 = vperm.xlu1 %467, %v14_v11  }
  0x5e   :  { %v153_v57 = vpop.permute.xlu2 %152 }
  0x5f   :  { %vm163_vm9 = vcmp.eq.s32.totalorder %v667_v62, %v153_v57 }
  0x67   :  { %v664_v61 = vpop.permute.xlu2 %23 }
  0x70   :  { %v84_v5 = vpop.permute.xlu2 %83 }
  0x74   :  { %v81_v58 = vpop.permute.xlu1 %80  ;;  %v21_v59 = vpop.permute.xlu0 %20 }
  0x75   :  { %vm31_vm0 = vcmp.eq.s32.totalorder %v667_v62, %v21_v59  ;;  %vm91_vm2 = vcmp.eq.s32.totalorder %v667_v62, %v81_v58  ;;  %vm32_vm4 = vcmp.eq.s32.totalorder %v671_v1, %v21_v59  ;;  %vm92_vm11 = vcmp.eq.s32.totalorder %v671_v1, %v81_v58 }
  0x76   :  { %vm33_vm13 = vcmp.eq.s32.totalorder %v680_v2, %v21_v59  ;;  %v356_v59 = vadd.s32 8, %v355_v54 }
  0x79   :  { %v27_v10 = vpop.permute.xlu2 %26 }
  0x7d   :  { %v117_v63 = vpop.permute.xlu1 %116  ;;  %v45_v0 = vpop.permute.xlu0 %44 }
  0x7e   :  { %vm55_vm1 = vcmp.eq.s32.totalorder %v667_v62, %v45_v0  ;;  %vm56_vm5 = vcmp.eq.s32.totalorder %v671_v1, %v45_v0  ;;  %vm127_vm7 = vcmp.eq.s32.totalorder %v667_v62, %v117_v63  ;;  %vm57_vm14 = vcmp.eq.s32.totalorder %v680_v2, %v45_v0  ;;  %v386_v0 = vld [vmem:[%s822_s1 + $0x1b0] sm:$0xff] }
  0x7f   :  { %vm67_vm3 = vmor %vm31_vm0, %vm55_vm1  ;;  %vm128_vm0 = vcmp.eq.s32.totalorder %v671_v1, %v117_v63 }
  0x80   :  { %vm103_vm6 = vmor %vm67_vm3, %vm91_vm2  ;;  %vm164_vm2 = vcmp.eq.s32.totalorder %v671_v1, %v153_v57 }
  0x81   :  { %vm139_vm8 = vmor %vm103_vm6, %vm127_vm7  ;;  %vm93_vm6 = vcmp.eq.s32.totalorder %v680_v2, %v81_v58 }
  0x82   :  { %vm175_vm10 = vmor %vm139_vm8, %vm163_vm9  ;;  %vm129_vm8 = vcmp.eq.s32.totalorder %v680_v2, %v117_v63  ;;  %v87_v14 = vpop.permute.xlu2 %86 }
  0x83   :  { %v425_v4 = vsel %vm175_vm10, 1.0, %v476_v3  ;;  %vm68_vm12 = vmor %vm32_vm4, %vm56_vm5  ;;  %vm34_vm4 = vcmp.eq.s32.totalorder %v667_v62, %v664_v61 }
  0x84   :  { %277 = vmatmul.f32.vlgmr.msra.gmra.mxu0 %v425_v4  ;;  %vm104_vm15 = vmor %vm68_vm12, %vm92_vm11  ;;  %vm165_vm11 = vcmp.eq.s32.totalorder %v680_v2, %v153_v57  ;;  %vm94_vm12 = vcmp.eq.s32.totalorder %v667_v62, %v84_v5 }
  0x85   :  { %vm140_vm1 = vmor %vm104_vm15, %vm128_vm0 }
  0x86   :  { %vm176_vm3 = vmor %vm140_vm1, %vm164_vm2  ;;  %v48_v6 = vpop.permute.xlu1 %47  ;;  %v120_v8 = vpop.permute.xlu0 %119  ;;  %vm95_vm2 = vcmp.eq.s32.totalorder %v671_v1, %v84_v5 }
  0x87   :  { %v426_v7 = vsel %vm176_vm3, 1.0, %v476_v3  ;;  %vm69_vm7 = vmor %vm33_vm13, %vm57_vm14  ;;  %vm58_vm9 = vcmp.eq.s32.totalorder %v667_v62, %v48_v6  ;;  %vm130_vm0 = vcmp.eq.s32.totalorder %v667_v62, %v120_v8  ;;  %vm35_vm13 = vcmp.eq.s32.totalorder %v671_v1, %v664_v61 }
  0x88   :  { %306 = vmatmul.f32.vlgmr.msra.gmra.mxu1 %v426_v7  ;;  %vm105_vm5 = vmor %vm69_vm7, %vm93_vm6  ;;  %vm59_vm14 = vcmp.eq.s32.totalorder %v671_v1, %v48_v6  ;;  %vm131_vm7 = vcmp.eq.s32.totalorder %v671_v1, %v120_v8 }
  0x89   :  { %vm141_vm10 = vmor %vm105_vm5, %vm129_vm8 }
  0x8a   :  { %vm177_vm15 = vmor %vm141_vm10, %vm165_vm11  ;;  %vm36_vm10 = vcmp.eq.s32.totalorder %v680_v2, %v664_v61  ;;  %vm60_vm11 = vcmp.eq.s32.totalorder %v680_v2, %v48_v6 }
  0x8b   :  { %v427_v9 = vsel %vm177_vm15, 1.0, %v476_v3  ;;  %vm70_vm1 = vmor %vm34_vm4, %vm58_vm9  ;;  %v30_v20 = vpop.permute.xlu2 %29 }
  0x8c   :  { %335 = vmatmul.f32.vlgmr.msra.gmra.mxu2 %v427_v9  ;;  %vm106_vm3 = vmor %vm70_vm1, %vm94_vm12  ;;  %vm96_vm1 = vcmp.eq.s32.totalorder %v680_v2, %v84_v5  ;;  %v384_v5 = vld [vmem:[%s822_s1 + $0x1a0] sm:$0xff] }
  0x8d   :  { %vm142_vm6 = vmor %vm106_vm3, %vm130_vm0 }
  0x8e   :  { %vm71_vm5 = vmor %vm35_vm13, %vm59_vm14  ;;  %vm132_vm13 = vcmp.eq.s32.totalorder %v680_v2, %v120_v8  ;;  %v123_v15 = vpop.permute.xlu0 %122 }
  0x8f   :  { %v156_v11 = vpop.permute.xlu1 %155  ;;  %vm107_vm8 = vmor %vm71_vm5, %vm95_vm2 }
  0x90   :  { %vm166_vm15 = vcmp.eq.s32.totalorder %v667_v62, %v156_v11  ;;  %vm143_vm4 = vmor %vm107_vm8, %vm131_vm7  ;;  %vm167_vm9 = vcmp.eq.s32.totalorder %v671_v1, %v156_v11  ;;  %vm168_vm2 = vcmp.eq.s32.totalorder %v680_v2, %v156_v11  ;;  %vm37_vm8 = vcmp.eq.s32.totalorder %v667_v62, %v27_v10 }
  0x91   :  { %vm178_vm12 = vmor %vm142_vm6, %vm166_vm15  ;;  %vm97_vm6 = vcmp.eq.s32.totalorder %v667_v62, %v87_v14 }
  0x92   :  { %v428_v12 = vsel %vm178_vm12, 1.0, %v476_v3  ;;  %vm179_vm0 = vmor %vm143_vm4, %vm167_vm9 }
  0x93   :  { %280 = vmatmul.f32.gmra.mxu0 %v428_v12  ;;  %v429_v13 = vsel %vm179_vm0, 1.0, %v476_v3  ;;  %vm72_vm14 = vmor %vm36_vm10, %vm60_vm11  ;;  %vm133_vm10 = vcmp.eq.s32.totalorder %v667_v62, %v123_v15  ;;  %vm38_vm11 = vcmp.eq.s32.totalorder %v671_v1, %v27_v10 }
  0x94   :  { %309 = vmatmul.f32.gmra.mxu1 %v429_v13  ;;  %vm108_vm3 = vmor %vm72_vm14, %vm96_vm1  ;;  %vm98_vm1 = vcmp.eq.s32.totalorder %v671_v1, %v87_v14  ;;  %vm39_vm14 = vcmp.eq.s32.totalorder %v680_v2, %v27_v10  ;;  %v126_v26 = vpop.permute.xlu2 %125  ;;  %v383_v10 = vld [vmem:[%s822_s1 + $0x198] sm:$0xff]  ;;  %v382_v13 = vld [vmem:[%s822_s1 + $0x190] sm:$0xff] }
  0x95   :  { %vm144_vm5 = vmor %vm108_vm3, %vm132_vm13  ;;  %vm134_vm13 = vcmp.eq.s32.totalorder %v671_v1, %v123_v15 }
  0x96   :  { %vm180_vm7 = vmor %vm144_vm5, %vm168_vm2  ;;  %vm99_vm5 = vcmp.eq.s32.totalorder %v680_v2, %v87_v14 }
  0x97   :  { %v430_v16 = vsel %vm180_vm7, 1.0, %v476_v3  ;;  %v54_v24 = vpop.permute.xlu0 %53 }
  0x98   :  { %338 = vmatmul.f32.gmra.mxu2 %v430_v16  ;;  %v51_v17 = vpop.permute.xlu1 %50 }
  0x99   :  { %vm61_vm15 = vcmp.eq.s32.totalorder %v667_v62, %v51_v17  ;;  %vm62_vm4 = vcmp.eq.s32.totalorder %v671_v1, %v51_v17  ;;  %vm63_vm2 = vcmp.eq.s32.totalorder %v680_v2, %v51_v17 }
  0x9a   :  { %vm73_vm9 = vmor %vm37_vm8, %vm61_vm15  ;;  %vm135_vm15 = vcmp.eq.s32.totalorder %v680_v2, %v123_v15 }
  0x9b   :  { %vm109_vm12 = vmor %vm73_vm9, %vm97_vm6 }
  0x9c   :  { %vm721_vm0 = vmor %vm109_vm12, %vm133_vm10 }
  0x9d   :  { %v825_v18 = vsel %vm721_vm0, 4294967295, %v824_v18  ;;  %vm74_vm3 = vmor %vm38_vm11, %vm62_vm4 }
  0x9e   :  { %vm110_vm7 = vmor %vm74_vm3, %vm98_vm1  ;;  %vm826_vm11 = vnez %v825_v18 }
  0x9f   :  { %vm146_vm8 = vmor %vm110_vm7, %vm134_vm13  ;;  %vm65_vm7 = vcmp.eq.s32.totalorder %v671_v1, %v54_v24 }
  0xa0   :  { %vm75_vm6 = vmor %vm39_vm14, %vm63_vm2  ;;  %vm40_vm14 = vcmp.eq.s32.totalorder %v667_v62, %v30_v20  ;;  %vm64_vm2 = vcmp.eq.s32.totalorder %v667_v62, %v54_v24 }
  0xa1   :  { %v159_v19 = vpop.permute.xlu1 %158  ;;  %vm111_vm9 = vmor %vm75_vm6, %vm99_vm5  ;;  %vm41_vm5 = vcmp.eq.s32.totalorder %v671_v1, %v30_v20 }
  0xa2   :  { %vm169_vm10 = vcmp.eq.s32.totalorder %v667_v62, %v159_v19  ;;  %vm170_vm12 = vcmp.eq.s32.totalorder %v671_v1, %v159_v19  ;;  %vm147_vm0 = vmor %vm111_vm9, %vm135_vm15  ;;  %vm171_vm4 = vcmp.eq.s32.totalorder %v680_v2, %v159_v19  ;;  %vm66_vm15 = vcmp.eq.s32.totalorder %v680_v2, %v54_v24 }
  0xa3   :  { %vm181_vm1 = vmor %vm826_vm11, %vm169_vm10  ;;  %vm136_vm11 = vcmp.eq.s32.totalorder %v667_v62, %v126_v26 }
  0xa4   :  { %v431_v21 = vsel %vm181_vm1, 1.0, %v476_v3  ;;  %vm182_vm3 = vmor %vm146_vm8, %vm170_vm12  ;;  %vm42_vm8 = vcmp.eq.s32.totalorder %v680_v2, %v30_v20 }
  0xa5   :  { %283 = vmatmul.f32.gmra.mxu0 %v431_v21  ;;  %v432_v22 = vsel %vm182_vm3, 1.0, %v476_v3  ;;  %vm183_vm13 = vmor %vm147_vm0, %vm171_vm4  ;;  %vm137_vm3 = vcmp.eq.s32.totalorder %v671_v1, %v126_v26 }
  0xa6   :  { %312 = vmatmul.f32.gmra.mxu1 %v432_v22  ;;  %v433_v23 = vsel %vm183_vm13, 1.0, %v476_v3  ;;  %vm76_vm6 = vmor %vm40_vm14, %vm64_vm2  ;;  %vm138_vm2 = vcmp.eq.s32.totalorder %v680_v2, %v126_v26 }
  0xa7   :  { %341 = vmatmul.f32.gmra.mxu2 %v433_v23  ;;  %vm77_vm9 = vmor %vm41_vm5, %vm65_vm7 }
  0xa8   :  { %vm78_vm12 = vmor %vm42_vm8, %vm66_vm15 }
  0xaa   :  { %v90_v25 = vpop.permute.xlu1 %89 }
  0xab   :  { %vm100_vm0 = vcmp.eq.s32.totalorder %v667_v62, %v90_v25  ;;  %vm101_vm10 = vcmp.eq.s32.totalorder %v671_v1, %v90_v25  ;;  %vm102_vm4 = vcmp.eq.s32.totalorder %v680_v2, %v90_v25 }
  0xac   :  { %vm112_vm1 = vmor %vm76_vm6, %vm100_vm0 }
  0xad   :  { %vm113_vm13 = vmor %vm77_vm9, %vm101_vm10 }
  0xae   :  { %vm114_vm14 = vmor %vm78_vm12, %vm102_vm4  ;;  %vm438_vm12 = vcmp.lt.s32.totalorder %v352_v39, 0  ;;  %v470_v39 = vld [vmem:[%s822_s1 + $0x210] ss:$0 sm:$0xff] }
  0xaf   :  { %vm148_vm5 = vmor %vm112_vm1, %vm136_vm11  ;;  %v441_v48 = vsel %vm438_vm12, %v439_v42, %v440_v43 }
  0xb0   :  { %vm149_vm7 = vmor %vm113_vm13, %vm137_vm3  ;;  %v442_v53 = vcvt.f32.s32 %v441_v48  ;;  %vm378_vm3 = vcmask 1040384   ;;  %vm380_vm13 = vcmask 1041408  }
  0xb1   :  { %vm150_vm6 = vmor %vm114_vm14, %vm138_vm2 }
  0xb2   :  { %v357_v60 = vperm.slane %v442_v53, 0 }
  0xb3   :  { %v162_v27 = vpop.permute.xlu1 %161 }
  0xb4   :  { %vm172_vm8 = vcmp.eq.s32.totalorder %v667_v62, %v162_v27  ;;  %vm173_vm15 = vcmp.eq.s32.totalorder %v671_v1, %v162_v27  ;;  %vm174_vm0 = vcmp.eq.s32.totalorder %v680_v2, %v162_v27  ;;  %v387_v62 = vld [vmem:[%s822_s1 + $0x1b8] sm:$0xff]  ;;  %vm359_vm11 = vcmp.lt.s32.totalorder %v356_v59, %v357_v60  ;;  %v385_v2 = vld [vmem:[%s822_s1 + $0x1a8] sm:$0xff] }
  0xb5   :  { %vm184_vm9 = vmor %vm148_vm5, %vm172_vm8  ;;  %410 = vmatpush.msra.mxu3 %v387_v62  ;;  %vm358_vm1 = vcmp.lt.s32.totalorder %v355_v54, %v357_v60 }
  0xb6   :  { %v434_v28 = vsel %vm184_vm9, 1.0, %v476_v3  ;;  %vm185_vm10 = vmor %vm149_vm7, %vm173_vm15 }
  0xb7   :  { %286 = vmatmul.f32.gmra.mxu0 %v434_v28  ;;  %v435_v29 = vsel %vm185_vm10, 1.0, %v476_v3  ;;  %vm186_vm4 = vmor %vm150_vm6, %vm174_vm0  ;;  %411 = vmatpush.msra.mxu3 %v386_v0 }
  0xb8   :  { %315 = vmatmul.f32.gmra.mxu1 %v435_v29  ;;  %v436_v30 = vsel %vm186_vm4, 1.0, %v476_v3 }
  0xb9   :  { %344 = vmatmul.f32.gmra.mxu2 %v436_v30  ;;  %412 = vmatpush.msra.mxu3 %v385_v2 }
  0xbb   :  { %413 = vmatpush.msra.mxu3 %v384_v5 }
  0xbd   :  { %414 = vmatpush.msra.mxu3 %v383_v10 }
  0xbf   :  { %415 = vmatpush.msra.mxu3 %v382_v13 }
 0x101   :  { %v278_v36 = vpop.f32.mrf.mxu0 }
 0x102   :  { %v279_v47 = vadd.f32 %v469_v41, %v278_v36 }
 0x105   :  { %v307_v37 = vpop.f32.mrf.mxu1 }
 0x106   :  { %v308_v57 = vadd.f32 %v307_v37, %v279_v47 }
 0x10f   :  { %v336_v38 = vpop.f32.mrf.mxu2 }
 0x110   :  { %v281_v40 = vpop.f32.mrf.mxu0  ;;  %v337_v63 = vadd.f32 %v336_v38, %v308_v57 }
 0x111   :  { %v282_v45 = vadd.f32 %v469_v41, %v281_v40  ;;  %v310_v49 = vpop.f32.mrf.mxu1 }
 0x112   :  { %v348_v3 = vmax.f32 %v337_v63, 0.0 }
 0x113   :  { %v311_v52 = vadd.f32 %v310_v49, %v282_v45 }
 0x114   :  { %v360_v11 = vsel %vm358_vm1, %v348_v3, 0.0 }
 0x11b   :  { %v339_v50 = vpop.f32.mrf.mxu2 }
 0x11c   :  { %v340_v58 = vadd.f32 %v339_v50, %v311_v52 }
 0x11e   :  { %v349_v1 = vmax.f32 %v340_v58, 0.0 }
 0x120   :  { %v361_v6 = vsel %vm359_vm11, %v349_v1, 0.0 }
 0x121   :  { %v362_v12 = vmax.f32 %v360_v11, %v361_v6 }
 0x122   :  { %v284_v61 = vpop.f32.mrf.mxu0 }
 0x123   :  { %v313_v4 = vpop.f32.mrf.mxu1  ;;  %v285_v7 = vadd.f32 %v469_v41, %v284_v61  ;;  %v363_v17 = vrot.slane %v362_v12, 4 }
 0x125   :  { %v314_v14 = vadd.f32 %v313_v4, %v285_v7  ;;  %v364_v23 = vmax.f32 %v362_v12, %v363_v17 }
 0x127   :  { %v365_v27 = vrot.slane %v364_v23, 2 }
 0x129   :  { %v366_v30 = vmax.f32 %v364_v23, %v365_v27 }
 0x12a   :  { %v342_v8 = vpop.f32.mrf.mxu2 }
 0x12b   :  { %v343_v16 = vadd.f32 %v342_v8, %v314_v14  ;;  %v367_v34 = vrot.slane %v366_v30, 1 }
 0x12d   :  { %v350_v21 = vmax.f32 %v343_v16, 0.0  ;;  %v368_v36 = vmax.f32 %v366_v30, %v367_v34 }
 0x12f   :  { %v369_v25 = vsel %vm358_vm1, %v350_v21, 0.0 }
 0x134   :  { %v287_v9 = vpop.f32.mrf.mxu0 }
 0x135   :  { %v288_v15 = vadd.f32 %v469_v41, %v287_v9  ;;  %v316_v18 = vpop.f32.mrf.mxu1 }
 0x137   :  { %v317_v19 = vadd.f32 %v316_v18, %v288_v15 }
 0x13c   :  { %v345_v20 = vpop.f32.mrf.mxu2 }
 0x13d   :  { %v346_v22 = vadd.f32 %v345_v20, %v317_v19 }
 0x13f   :  { %v351_v24 = vmax.f32 %v346_v22, 0.0 }
 0x141   :  { %v370_v26 = vsel %vm359_vm11, %v351_v24, 0.0 }
 0x142   :  { %v371_v28 = vmax.f32 %v369_v25, %v370_v26 }
 0x144   :  { %v372_v29 = vrot.slane %v371_v28, 4 }
 0x146   :  { %v373_v31 = vmax.f32 %v371_v28, %v372_v29 }
 0x148   :  { %v374_v32 = vrot.slane %v373_v31, 2 }
 0x14a   :  { %v375_v33 = vmax.f32 %v373_v31, %v374_v32 }
 0x14c   :  { %v376_v35 = vrot.slane %v375_v33, 1 }
 0x14e   :  { %v377_v37 = vmax.f32 %v375_v33, %v376_v35 }
 0x150   :  { %v379_v38 = vsel %vm378_vm3, %v368_v36, %v377_v37 }
 0x151   :  { %437 = vmatmul.msk.f32.vlgmr.msra.gmra.mxu3 %vm380_vm13, %v379_v38 }
 0x1d4   :  { %v417_v40 = vpop.f32.mrf.mxu3 }
 0x1d5   :  { %v418_v41 = vadd.f32 %v470_v39, %v417_v40 }
 0x1d7   :  { %420 = vst [vmem:[%s823_s2] sm:$0xff] %v418_v41 }

</bundles_post_ra>
